<compile_context>
chip_gen: v7x
topology: tpu7x:2x2x1
jax: 0.10.0
libtpu: 0.0.40
codegen_flags: <defaults>
</compile_context>

<pallas_src>
import jax
import jax.numpy as jnp
from jax.experimental import pallas as pl
from jax.experimental.pallas import tpu as pltpu

IN_F = 500
HID_F = 500
OUT_F = 10

PAD_IN = 512    # 500 -> 512 (lane-aligned)
PAD_HID = 512   # 500 -> 512
PAD_OUT = 128   # 10  -> 128 (lane-dense output store)


def _round_up(n, m):
    return (n + m - 1) // m * m


def _decoder_kernel(x_ref, w4_ref, b4_ref, w5_ref, b5_ref, w6_ref, b6_ref, o_ref):
    # x_ref : (TB, 512) bf16
    # w4/w5 : (512, 512) bf16, w6: (512, 128) bf16
    # b4/b5 : (1, 512) f32,    b6: (1, 128) f32
    # o_ref : (TB, 128) f32
    x = x_ref[...]

    # fc4 + ReLU  (bf16 operands, f32 accumulation, f32 epilogue)
    h = jnp.dot(x, w4_ref[...], preferred_element_type=jnp.float32) + b4_ref[...]
    h = jnp.maximum(h, 0.0)

    # fc5 + ReLU
    h = jnp.dot(h.astype(jnp.bfloat16), w5_ref[...],
                preferred_element_type=jnp.float32) + b5_ref[...]
    h = jnp.maximum(h, 0.0)

    # dropout(p=0.3): identity in eval mode.
    # TODO(synk): training-mode dropout would use pltpu.prng_seed + prng_random_bits.

    # fc6
    o_ref[...] = jnp.dot(h.astype(jnp.bfloat16), w6_ref[...],
                         preferred_element_type=jnp.float32) + b6_ref[...]


def decoder_forward(x, params):
    """x: (B, 500) float32 -> (B, 1, 10) float32 (matches PyTorch forward)."""
    w4, b4, w5, b5, w6, b6 = params
    B = x.shape[0]

    # --- batch tiling -------------------------------------------------------
    TB = min(128, _round_up(B, 8))        # 128-row tiles (MXU height); small B -> pad to 8
    Bp = _round_up(B, TB)

    # --- pad to lane-aligned shapes & cast weights to bf16 -------------------
    xp = jnp.zeros((Bp, PAD_IN), jnp.float32).at[:B, :IN_F].set(x).astype(jnp.bfloat16)

    def pad_w(w, pin, pout):
        return jnp.zeros((pin, pout), jnp.float32).at[:w.shape[0], :w.shape[1]].set(w) \
                  .astype(jnp.bfloat16)

    def pad_b(b, pout):
        return jnp.zeros((1, pout), jnp.float32).at[:, :b.shape[1]].set(b)

    w4p, b4p = pad_w(w4, PAD_IN, PAD_HID), pad_b(b4, PAD_HID)
    w5p, b5p = pad_w(w5, PAD_HID, PAD_HID), pad_b(b5, PAD_HID)
    w6p, b6p = pad_w(w6, PAD_HID, PAD_OUT), pad_b(b6, PAD_OUT)

    grid = (Bp // TB,)

    flops = 2 * Bp * (PAD_IN * PAD_HID + PAD_HID * PAD_HID + PAD_HID * PAD_OUT)
    bytes_accessed = (xp.size * 2
                      + (w4p.size + w5p.size + w6p.size) * 2
                      + (b4p.size + b5p.size + b6p.size) * 4
                      + Bp * PAD_OUT * 4)

    out2d = pl.pallas_call(
        _decoder_kernel,
        out_shape=jax.ShapeDtypeStruct((Bp, PAD_OUT), jnp.float32),
        grid=grid,
        in_specs=[
            pl.BlockSpec((TB, PAD_IN), lambda i: (i, 0)),        # x tile (pipelined)
            pl.BlockSpec((PAD_IN, PAD_HID), lambda i: (0, 0)),   # w4 (resident)
            pl.BlockSpec((1, PAD_HID), lambda i: (0, 0)),        # b4
            pl.BlockSpec((PAD_HID, PAD_HID), lambda i: (0, 0)),  # w5
            pl.BlockSpec((1, PAD_HID), lambda i: (0, 0)),        # b5
            pl.BlockSpec((PAD_HID, PAD_OUT), lambda i: (0, 0)),  # w6
            pl.BlockSpec((1, PAD_OUT), lambda i: (0, 0)),        # b6
        ],
        out_specs=pl.BlockSpec((TB, PAD_OUT), lambda i: (i, 0)),
        compiler_params=pltpu.CompilerParams(
            dimension_semantics=("parallel",)),
        cost_estimate=pl.CostEstimate(
            flops=flops, transcendentals=0, bytes_accessed=bytes_accessed),
    )(xp, w4p, b4p, w5p, b5p, w6p, b6p)

    # strip batch/feature padding, restore the unsqueezed seq axis
    return out2d[:B, :OUT_F].reshape(B, 1, OUT_F)


def init_params(key):
    """PyTorch-Linear-style init (uniform(-1/sqrt(fan_in), +1/sqrt(fan_in))).

    Weights stored pre-transposed as (in_features, out_features), f32."""
    k = jax.random.split(key, 6)

    def lin(kw, kb, fan_in, fan_out):
        bound = 1.0 / jnp.sqrt(jnp.float32(fan_in))
        w = jax.random.uniform(kw, (fan_in, fan_out), jnp.float32, -bound, bound)
        b = jax.random.uniform(kb, (1, fan_out), jnp.float32, -bound, bound)
        return w, b

    w4, b4 = lin(k[0], k[1], IN_F, HID_F)
    w5, b5 = lin(k[2], k[3], HID_F, HID_F)
    w6, b6 = lin(k[4], k[5], HID_F, OUT_F)
    return (w4, b4, w5, b5, w6, b6)


def decoder_ref(x, params):
    """Pure-JAX reference with the same bf16-operand / f32-accumulate recipe."""
    w4, b4, w5, b5, w6, b6 = params
    bf = jnp.bfloat16
    h = jnp.dot(x.astype(bf), w4.astype(bf), preferred_element_type=jnp.float32) + b4
    h = jnp.maximum(h, 0.0)
    h = jnp.dot(h.astype(bf), w5.astype(bf), preferred_element_type=jnp.float32) + b5
    h = jnp.maximum(h, 0.0)
    return jnp.dot(h.astype(bf), w6.astype(bf), preferred_element_type=jnp.float32) + b6


if __name__ == "__main__":
    key = jax.random.PRNGKey(0)
    kx, kp = jax.random.split(key)

    B = 8
    x = jax.random.normal(kx, (B, IN_F), jnp.float32)   # PyTorch input shape (B, 500)
    params = init_params(kp)

    out = decoder_forward(x, params)
    out = jax.block_until_ready(out)

    ref = decoder_ref(x, params).reshape(B, 1, OUT_F)
    assert out.shape == (B, 1, OUT_F), out.shape
    assert jnp.allclose(out, ref, atol=2e-3, rtol=2e-3), "mismatch vs reference"

    print("KERNEL_OK")
</pallas_src>

<mosaic_0001>
module attributes {stable_mosaic.version = 11 : i64} {
  func.func @_decoder_kernel(%arg0: i32, %arg1: memref<8x512xbf16, #tpu.memory_space<vmem>>, %arg2: memref<512x512xbf16, #tpu.memory_space<vmem>>, %arg3: memref<1x512xf32, #tpu.memory_space<vmem>>, %arg4: memref<512x512xbf16, #tpu.memory_space<vmem>>, %arg5: memref<1x512xf32, #tpu.memory_space<vmem>>, %arg6: memref<512x128xbf16, #tpu.memory_space<vmem>>, %arg7: memref<1x128xf32, #tpu.memory_space<vmem>>, %arg8: memref<8x128xf32, #tpu.memory_space<vmem>>) attributes {dimension_semantics = [#tpu.dimension_semantics<parallel>], iteration_bounds = array<i64: 1>, scalar_prefetch = 0 : i64, scratch_operands = 0 : i64, tpu.core_type = #tpu.core_type<tc>, window_params = [{transform_indices = @transform_0, window_bounds = array<i64: 8, 512>}, {pipeline_mode = #tpu.pipeline_mode<synchronous>, transform_indices = @transform_1, window_bounds = array<i64: 512, 512>}, {pipeline_mode = #tpu.pipeline_mode<synchronous>, transform_indices = @transform_2, window_bounds = array<i64: 1, 512>}, {pipeline_mode = #tpu.pipeline_mode<synchronous>, transform_indices = @transform_3, window_bounds = array<i64: 512, 512>}, {pipeline_mode = #tpu.pipeline_mode<synchronous>, transform_indices = @transform_4, window_bounds = array<i64: 1, 512>}, {pipeline_mode = #tpu.pipeline_mode<synchronous>, transform_indices = @transform_5, window_bounds = array<i64: 512, 128>}, {pipeline_mode = #tpu.pipeline_mode<synchronous>, transform_indices = @transform_6, window_bounds = array<i64: 1, 128>}, {transform_indices = @transform_7, window_bounds = array<i64: 8, 128>}]} {
    %c0 = arith.constant 0 : index
    %c0_0 = arith.constant 0 : index
    %0 = vector.load %arg1[%c0, %c0_0] : memref<8x512xbf16, #tpu.memory_space<vmem>>, vector<8x512xbf16>
    %c0_1 = arith.constant 0 : index
    %c0_2 = arith.constant 0 : index
    %1 = vector.load %arg2[%c0_1, %c0_2] : memref<512x512xbf16, #tpu.memory_space<vmem>>, vector<512x512xbf16>
    %cst = arith.constant dense<0.000000e+00> : vector<8x512xf32>
    %2 = tpu.matmul %0, %1, %cst {dimension_numbers = #tpu.dot_dimension_numbers<[1], [0], [0], [1], [0, 0, 1, 1], [], []>} : vector<8x512xbf16>, vector<512x512xbf16>, vector<8x512xf32> -> vector<8x512xf32>
    %c0_3 = arith.constant 0 : index
    %c0_4 = arith.constant 0 : index
    %3 = vector.load %arg3[%c0_3, %c0_4] : memref<1x512xf32, #tpu.memory_space<vmem>>, vector<1x512xf32>
    %4 = vector.broadcast %3 : vector<1x512xf32> to vector<8x512xf32>
    %5 = arith.addf %2, %4 : vector<8x512xf32>
    %cst_5 = arith.constant 0.000000e+00 : f32
    %6 = vector.broadcast %cst_5 : f32 to vector<8x512xf32>
    %7 = arith.maximumf %5, %6 : vector<8x512xf32>
    %8 = arith.truncf %7 : vector<8x512xf32> to vector<8x512xbf16>
    %c0_6 = arith.constant 0 : index
    %c0_7 = arith.constant 0 : index
    %9 = vector.load %arg4[%c0_6, %c0_7] : memref<512x512xbf16, #tpu.memory_space<vmem>>, vector<512x512xbf16>
    %cst_8 = arith.constant dense<0.000000e+00> : vector<8x512xf32>
    %10 = tpu.matmul %8, %9, %cst_8 {dimension_numbers = #tpu.dot_dimension_numbers<[1], [0], [0], [1], [0, 0, 1, 1], [], []>} : vector<8x512xbf16>, vector<512x512xbf16>, vector<8x512xf32> -> vector<8x512xf32>
    %c0_9 = arith.constant 0 : index
    %c0_10 = arith.constant 0 : index
    %11 = vector.load %arg5[%c0_9, %c0_10] : memref<1x512xf32, #tpu.memory_space<vmem>>, vector<1x512xf32>
    %12 = vector.broadcast %11 : vector<1x512xf32> to vector<8x512xf32>
    %13 = arith.addf %10, %12 : vector<8x512xf32>
    %cst_11 = arith.constant 0.000000e+00 : f32
    %14 = vector.broadcast %cst_11 : f32 to vector<8x512xf32>
    %15 = arith.maximumf %13, %14 : vector<8x512xf32>
    %16 = arith.truncf %15 : vector<8x512xf32> to vector<8x512xbf16>
    %c0_12 = arith.constant 0 : index
    %c0_13 = arith.constant 0 : index
    %17 = vector.load %arg6[%c0_12, %c0_13] : memref<512x128xbf16, #tpu.memory_space<vmem>>, vector<512x128xbf16>
    %cst_14 = arith.constant dense<0.000000e+00> : vector<8x128xf32>
    %18 = tpu.matmul %16, %17, %cst_14 {dimension_numbers = #tpu.dot_dimension_numbers<[1], [0], [0], [1], [0, 0, 1, 1], [], []>} : vector<8x512xbf16>, vector<512x128xbf16>, vector<8x128xf32> -> vector<8x128xf32>
    %c0_15 = arith.constant 0 : index
    %c0_16 = arith.constant 0 : index
    %19 = vector.load %arg7[%c0_15, %c0_16] : memref<1x128xf32, #tpu.memory_space<vmem>>, vector<1x128xf32>
    %20 = vector.broadcast %19 : vector<1x128xf32> to vector<8x128xf32>
    %21 = arith.addf %18, %20 : vector<8x128xf32>
    %c0_17 = arith.constant 0 : index
    %c0_18 = arith.constant 0 : index
    %22 = vector.load %arg8[%c0_17, %c0_18] : memref<8x128xf32, #tpu.memory_space<vmem>>, vector<8x128xf32>
    tpu.vector_store %arg8[%c0_17, %c0_18], %21 {strides = array<i32>} : memref<8x128xf32, #tpu.memory_space<vmem>>, vector<8x128xf32>,
    return
  }
  func.func @transform_0(%arg0: i32) -> (i32, i32) {
    %c0_i32 = arith.constant 0 : i32
    %c0_i32_0 = arith.constant 0 : i32
    return %arg0, %c0_i32 : i32, i32
  }
  func.func @transform_1(%arg0: i32) -> (i32, i32) {
    %c0_i32 = arith.constant 0 : i32
    %c0_i32_0 = arith.constant 0 : i32
    %c0_i32_1 = arith.constant 0 : i32
    return %c0_i32, %c0_i32_0 : i32, i32
  }
  func.func @transform_2(%arg0: i32) -> (i32, i32) {
    %c0_i32 = arith.constant 0 : i32
    %c0_i32_0 = arith.constant 0 : i32
    %c0_i32_1 = arith.constant 0 : i32
    return %c0_i32, %c0_i32_0 : i32, i32
  }
  func.func @transform_3(%arg0: i32) -> (i32, i32) {
    %c0_i32 = arith.constant 0 : i32
    %c0_i32_0 = arith.constant 0 : i32
    %c0_i32_1 = arith.constant 0 : i32
    return %c0_i32, %c0_i32_0 : i32, i32
  }
  func.func @transform_4(%arg0: i32) -> (i32, i32) {
    %c0_i32 = arith.constant 0 : i32
    %c0_i32_0 = arith.constant 0 : i32
    %c0_i32_1 = arith.constant 0 : i32
    return %c0_i32, %c0_i32_0 : i32, i32
  }
  func.func @transform_5(%arg0: i32) -> (i32, i32) {
    %c0_i32 = arith.constant 0 : i32
    %c0_i32_0 = arith.constant 0 : i32
    %c0_i32_1 = arith.constant 0 : i32
    return %c0_i32, %c0_i32_0 : i32, i32
  }
  func.func @transform_6(%arg0: i32) -> (i32, i32) {
    %c0_i32 = arith.constant 0 : i32
    %c0_i32_0 = arith.constant 0 : i32
    %c0_i32_1 = arith.constant 0 : i32
    return %c0_i32, %c0_i32_0 : i32, i32
  }
  func.func @transform_7(%arg0: i32) -> (i32, i32) {
    %c0_i32 = arith.constant 0 : i32
    %c0_i32_0 = arith.constant 0 : i32
    return %arg0, %c0_i32 : i32, i32
  }
}

</mosaic_0001>

<bundles_post_ra>
// kernel: tpu_custom_call.1
= control target key start
LH: loop header
LB: loop body
LE: loop exit
PB: predicated region body
PF: predicated region fallthrough
CT: control target
= control target key end

     0   :  { %12 = vsyncpa [#allocation3], 0  ;;  %s3451_s0 = inlined_call_operand.hbm [shape: bf16[8,512], index: 0, kind: input, shape index: {}]   ;;  %s3452_s1 = inlined_call_operand.hbm [shape: bf16[512,512], index: 1, kind: input, shape index: {}]   ;;  %s3453_s2 = inlined_call_operand.vmem [shape: f32[1,512], index: 2, kind: input, shape index: {}]   ;;  %s3454_s3 = inlined_call_operand.hbm [shape: bf16[512,512], index: 3, kind: input, shape index: {}]   ;;  %s3455_s4 = inlined_call_operand.vmem [shape: f32[1,512], index: 4, kind: input, shape index: {}]   ;;  %s3456_s5 = inlined_call_operand.hbm [shape: bf16[512,128], index: 5, kind: input, shape index: {}]   ;;  %s3457_s6 = inlined_call_operand.vmem [shape: f32[1,128], index: 6, kind: input, shape index: {}]   ;;  %s3458_s7 = inlined_call_operand.hbm [shape: f32[8,128], index: 7, kind: output, shape index: {}]  }
   0x1   :  { %13 = vsyncpa [#allocation6], 0 }
   0x2   :  { %14 = vsyncpa [#allocation9], 0 }
   0x3   :  { %15 = vsyncpa [#allocation4], 0  ;;  %s3290_s24 = smov [#allocation5]   ;;  %s3172_s28 = scalar_lea.hbm %s3452_s1, 16384 }
   0x4   :  { %s31_s25 = sshll.u32 %s3290_s24, 4  ;;  %p3173_p0 = scmp.ne.s32.totalorder %s3452_s1, %s3172_s28  ;;  %s32_s25 = int_to_ptr.vmem [resolvable:$true] %s31_s25 }
   0x5   :  { %p3176_p1 = scmp.lt.u32.totalorder %s3172_s28, %s3452_s1 }
   0x7   :  { %p3178_p2 = pnand %p3176_p1, %p3173_p0 }
   0x9   :  { %3181 = shalt.err (!%p3178_p2)
}
   0xa   :  { %s3182_s10 = scalar_lea.vmem %s32_s25, 16384  ;;  %p3187_p4 = scmp.lt.s32.totalorder %s32_s25, %s32_s25 }
   0xb   :  { %p3183_p3 = scmp.ne.s32.totalorder %s32_s25, %s3182_s10  ;;  %p3188_p5 = scmp.lt.s32.totalorder %s3182_s10, %s3182_s10 }
   0xd   :  { %p3189_p6 = por %p3188_p5, %p3187_p4 }
   0xf   :  { %p3190_p7 = pnand %p3189_p6, %p3183_p3 }
  0x11   :  { %3193 = shalt.err (!%p3190_p7)
}
  0x12   :  { %s3291_s11 = smov 256   ;;  %s3292_s12 = smov 16  }
  0x13   :  { %37 = dma.hbm_to_vmem [thread:$0]  %s3452_s1, 16384, %s32_s25, [#allocation6], %s3291_s11, %s3291_s11, %s3292_s12  }
  0x14   :  { %s3293_s15 = smov [#allocation2]   ;;  %s3294_s17 = smov [#allocation7]  }
  0x15   :  { %s22_s16 = sshll.u32 %s3293_s15, 4  ;;  %s45_s18 = sshll.u32 %s3294_s17, 4  ;;  %s23_s16 = int_to_ptr.vmem [resolvable:$true] %s22_s16  ;;  %s46_s18 = int_to_ptr.vmem [resolvable:$true] %s45_s18 }
  0x16   :  { %s3194_s21 = scalar_lea.hbm %s3451_s0, 256 }
  0x17   :  { %p3195_p8 = scmp.ne.s32.totalorder %s3451_s0, %s3194_s21  ;;  %p3198_p9 = scmp.lt.u32.totalorder %s3194_s21, %s3451_s0 }
  0x19   :  { %p3200_p10 = pnand %p3198_p9, %p3195_p8 }
  0x1b   :  { %3203 = shalt.err (!%p3200_p10)
}
  0x1c   :  { %s3204_s1 = scalar_lea.vmem %s23_s16, 256  ;;  %p3209_p12 = scmp.lt.s32.totalorder %s23_s16, %s23_s16 }
  0x1d   :  { %p3205_p11 = scmp.ne.s32.totalorder %s23_s16, %s3204_s1  ;;  %p3210_p13 = scmp.lt.s32.totalorder %s3204_s1, %s3204_s1 }
  0x1f   :  { %p3211_p0 = por %p3210_p13, %p3209_p12 }
  0x21   :  { %p3212_p1 = pnand %p3211_p0, %p3205_p11 }
  0x23   :  { %3215 = shalt.err (!%p3212_p1)
}
  0x24   :  { %25 = dma.hbm_to_vmem [thread:$0]  %s3451_s0, 256, %s23_s16, [#allocation3]  }
  0x25   :  { %s3216_s30 = scalar_lea.hbm %s3454_s3, 16384 }
  0x26   :  { %p3217_p2 = scmp.ne.s32.totalorder %s3454_s3, %s3216_s30  ;;  %p3220_p3 = scmp.lt.u32.totalorder %s3216_s30, %s3454_s3 }
  0x28   :  { %p3222_p4 = pnand %p3220_p3, %p3217_p2 }
  0x2a   :  { %3225 = shalt.err (!%p3222_p4)
}
  0x2b   :  { %s3226_s14 = scalar_lea.vmem %s46_s18, 16384  ;;  %p3231_p6 = scmp.lt.s32.totalorder %s46_s18, %s46_s18 }
  0x2c   :  { %p3227_p5 = scmp.ne.s32.totalorder %s46_s18, %s3226_s14  ;;  %p3232_p7 = scmp.lt.s32.totalorder %s3226_s14, %s3226_s14 }
  0x2e   :  { %p3233_p8 = por %p3232_p7, %p3231_p6 }
  0x30   :  { %p3234_p9 = pnand %p3233_p8, %p3227_p5 }
  0x32   :  { %3237 = shalt.err (!%p3234_p9)
}
  0x33   :  { %51 = dma.hbm_to_vmem [thread:$0]  %s3454_s3, 16384, %s46_s18, [#allocation6], %s3291_s11, %s3291_s11, %s3292_s12  }
  0x34   :  { %s3295_s16 = smov [#allocation8]   ;;  %s3238_s21 = scalar_lea.hbm %s3456_s5, 4096 }
  0x35   :  { %s59_s17 = sshll.u32 %s3295_s16, 4  ;;  %p3239_p10 = scmp.ne.s32.totalorder %s3456_s5, %s3238_s21  ;;  %s60_s17 = int_to_ptr.vmem [resolvable:$true] %s59_s17 }
  0x36   :  { %p3242_p11 = scmp.lt.u32.totalorder %s3238_s21, %s3456_s5 }
  0x38   :  { %p3244_p12 = pnand %p3242_p11, %p3239_p10 }
  0x3a   :  { %3247 = shalt.err (!%p3244_p12)
}
  0x3b   :  { %s3248_s1 = scalar_lea.vmem %s60_s17, 4096  ;;  %p3253_p0 = scmp.lt.s32.totalorder %s60_s17, %s60_s17 }
  0x3c   :  { %p3249_p13 = scmp.ne.s32.totalorder %s60_s17, %s3248_s1  ;;  %p3254_p1 = scmp.lt.s32.totalorder %s3248_s1, %s3248_s1 }
  0x3e   :  { %p3255_p2 = por %p3254_p1, %p3253_p0 }
  0x40   :  { %p3256_p3 = pnand %p3255_p2, %p3249_p13 }
  0x42   :  { %3259 = shalt.err (!%p3256_p3)
}
  0x43   :  { %s3296_s3 = smov 64   ;;  %s3297_s11 = smov 4  }
  0x44   :  { %65 = dma.hbm_to_vmem [thread:$0]  %s3456_s5, 4096, %s60_s17, [#allocation9], %s3296_s3, %s3296_s3, %s3297_s11  }
  0x45   :  { %3282 = dma.done.wait [#allocation3], 256  }
  0x46   :  { %3283 = vsyncadd [#allocation3], 4294967040 }
  0x47   :  { %3284 = dma.done.wait [#allocation6], 32768  }
  0x48   :  { %3285 = vsyncadd [#allocation6], 4294934528 }
  0x49   :  { %3286 = dma.done.wait [#allocation9], 4096  }
  0x4a   :  { %3287 = vsyncadd [#allocation9], 4294963200  ;;  %v2752_v0 = vld [vmem:[#allocation5 + $0x4] ss:$16 sps:$4 sm:$0xff]   ;;  %v2754_v1 = vld [vmem:[#allocation5 + $0xc] ss:$16 sps:$4 sm:$0xff]  }
  0x4b   :  { %887 = vmatprep.subr.bf16.mxu0 %v2752_v0  ;;  %v2756_v2 = vld [vmem:[#allocation5] ss:$16 sps:$4 sm:$0xff]   ;;  %v2757_v3 = vld [vmem:[#allocation5 + $0x8] ss:$16 sps:$4 sm:$0xff]   ;;  %969 = vmatprep.subr.bf16.mxu1 %v2754_v1  ;;  %v2758_v4 = vld [vmem:[#allocation5 + $0x24] ss:$16 sps:$4 sm:$0xff]  }
  0x4c   :  { %888 = vmatpush1.bf16.msra.mxu0 %v2756_v2  ;;  %970 = vmatpush1.bf16.msra.mxu1 %v2757_v3  ;;  %v2760_v5 = vld [vmem:[#allocation5 + $0x2c] ss:$16 sps:$4 sm:$0xff]   ;;  %v2762_v6 = vld [vmem:[#allocation5 + $0x20] ss:$16 sps:$4 sm:$0xff]   ;;  %v2763_v7 = vld [vmem:[#allocation5 + $0x28] ss:$16 sps:$4 sm:$0xff]  }
  0x4d   :  { %889 = vmatprep.subr.bf16.mxu0 %v2758_v4  ;;  %971 = vmatprep.subr.bf16.mxu1 %v2760_v5  ;;  %v2764_v8 = vld [vmem:[#allocation5 + $0x44] ss:$16 sps:$4 sm:$0xff]   ;;  %v2766_v9 = vld [vmem:[#allocation5 + $0x4c] ss:$16 sps:$4 sm:$0xff]   ;;  %v2768_v10 = vld [vmem:[#allocation5 + $0x40] ss:$16 sps:$4 sm:$0xff]  }
  0x4e   :  { %v2769_v11 = vld [vmem:[#allocation5 + $0x48] ss:$16 sps:$4 sm:$0xff]   ;;  %v2770_v12 = vld [vmem:[#allocation5 + $0x64] ss:$16 sps:$4 sm:$0xff]   ;;  %v2772_v13 = vld [vmem:[#allocation5 + $0x6c] ss:$16 sps:$4 sm:$0xff]  }
  0x4f   :  { %v2774_v14 = vld [vmem:[#allocation5 + $0x60] ss:$16 sps:$4 sm:$0xff]   ;;  %v2775_v15 = vld [vmem:[#allocation5 + $0x68] ss:$16 sps:$4 sm:$0xff]   ;;  %v2776_v16 = vld [vmem:[#allocation5 + $0x84] ss:$16 sps:$4 sm:$0xff]  }
  0x50   :  { %890 = vmatpush1.bf16.msra.mxu0 %v2762_v6  ;;  %972 = vmatpush1.bf16.msra.mxu1 %v2763_v7  ;;  %v2778_v17 = vld [vmem:[#allocation5 + $0x8c] ss:$16 sps:$4 sm:$0xff]   ;;  %v2780_v18 = vld [vmem:[#allocation5 + $0x80] ss:$16 sps:$4 sm:$0xff]   ;;  %v2781_v19 = vld [vmem:[#allocation5 + $0x88] ss:$16 sps:$4 sm:$0xff]  }
  0x51   :  { %891 = vmatprep.subr.bf16.mxu0 %v2764_v8  ;;  %973 = vmatprep.subr.bf16.mxu1 %v2766_v9  ;;  %v2782_v20 = vld [vmem:[#allocation5 + $0xa4] ss:$16 sps:$4 sm:$0xff]   ;;  %v2784_v21 = vld [vmem:[#allocation5 + $0xac] ss:$16 sps:$4 sm:$0xff]   ;;  %v2786_v22 = vld [vmem:[#allocation5 + $0xa0] ss:$16 sps:$4 sm:$0xff]  }
  0x52   :  { %v2787_v23 = vld [vmem:[#allocation5 + $0xa8] ss:$16 sps:$4 sm:$0xff]   ;;  %v2788_v24 = vld [vmem:[#allocation5 + $0xc4] ss:$16 sps:$4 sm:$0xff]   ;;  %v2790_v25 = vld [vmem:[#allocation5 + $0xcc] ss:$16 sps:$4 sm:$0xff]  }
  0x53   :  { %v2792_v26 = vld [vmem:[#allocation5 + $0xc0] ss:$16 sps:$4 sm:$0xff]   ;;  %v2793_v27 = vld [vmem:[#allocation5 + $0xc8] ss:$16 sps:$4 sm:$0xff]   ;;  %v2794_v28 = vld [vmem:[#allocation5 + $0xe4] ss:$16 sps:$4 sm:$0xff]  }
  0x54   :  { %892 = vmatpush1.bf16.msra.mxu0 %v2768_v10  ;;  %974 = vmatpush1.bf16.msra.mxu1 %v2769_v11  ;;  %v2796_v29 = vld [vmem:[#allocation5 + $0xec] ss:$16 sps:$4 sm:$0xff]   ;;  %v2798_v30 = vld [vmem:[#allocation5 + $0xe0] ss:$16 sps:$4 sm:$0xff]   ;;  %v2799_v31 = vld [vmem:[#allocation5 + $0xe8] ss:$16 sps:$4 sm:$0xff]  }
  0x55   :  { %893 = vmatprep.subr.bf16.mxu0 %v2770_v12  ;;  %975 = vmatprep.subr.bf16.mxu1 %v2772_v13  ;;  %v2800_v32 = vld [vmem:[#allocation5 + $0x104] ss:$16 sps:$4 sm:$0xff]   ;;  %v2802_v33 = vld [vmem:[#allocation5 + $0x10c] ss:$16 sps:$4 sm:$0xff]   ;;  %v2804_v34 = vld [vmem:[#allocation5 + $0x100] ss:$16 sps:$4 sm:$0xff]  }
  0x56   :  { %v2805_v35 = vld [vmem:[#allocation5 + $0x108] ss:$16 sps:$4 sm:$0xff]   ;;  %v2806_v36 = vld [vmem:[#allocation5 + $0x124] ss:$16 sps:$4 sm:$0xff]   ;;  %v2808_v37 = vld [vmem:[#allocation5 + $0x12c] ss:$16 sps:$4 sm:$0xff]  }
  0x57   :  { %v2810_v38 = vld [vmem:[#allocation5 + $0x120] ss:$16 sps:$4 sm:$0xff]   ;;  %v2811_v39 = vld [vmem:[#allocation5 + $0x128] ss:$16 sps:$4 sm:$0xff]   ;;  %v2812_v40 = vld [vmem:[#allocation5 + $0x144] ss:$16 sps:$4 sm:$0xff]  }
  0x58   :  { %894 = vmatpush1.bf16.msra.mxu0 %v2774_v14  ;;  %976 = vmatpush1.bf16.msra.mxu1 %v2775_v15  ;;  %v2814_v41 = vld [vmem:[#allocation5 + $0x14c] ss:$16 sps:$4 sm:$0xff]   ;;  %v2816_v42 = vld [vmem:[#allocation5 + $0x140] ss:$16 sps:$4 sm:$0xff]   ;;  %v2817_v43 = vld [vmem:[#allocation5 + $0x148] ss:$16 sps:$4 sm:$0xff]  }
  0x59   :  { %895 = vmatprep.subr.bf16.mxu0 %v2776_v16  ;;  %977 = vmatprep.subr.bf16.mxu1 %v2778_v17  ;;  %v2818_v44 = vld [vmem:[#allocation5 + $0x164] ss:$16 sps:$4 sm:$0xff]   ;;  %v2820_v45 = vld [vmem:[#allocation5 + $0x16c] ss:$16 sps:$4 sm:$0xff]   ;;  %v2822_v47 = vld [vmem:[#allocation5 + $0x160] ss:$16 sps:$4 sm:$0xff]  }
  0x5a   :  { %v81_v46 = vld [vmem:[#allocation2] sm:$0xff]  ;;  %v2823_v49 = vld [vmem:[#allocation5 + $0x168] ss:$16 sps:$4 sm:$0xff]   ;;  %v2826_v51 = vld [vmem:[#allocation5 + $0x18c] ss:$16 sps:$4 sm:$0xff]   ;;  %s3298_s29 = smov [#allocation10]  }
  0x5b   :  { %v2383_v48 = vcombine.high %v81_v46, %v81_v46  ;;  %v2824_v50 = vld [vmem:[#allocation5 + $0x184] ss:$16 sps:$4 sm:$0xff]   ;;  %v2828_v52 = vld [vmem:[#allocation5 + $0x180] ss:$16 sps:$4 sm:$0xff]   ;;  %v2829_v53 = vld [vmem:[#allocation5 + $0x188] ss:$16 sps:$4 sm:$0xff]   ;;  %v2382_v4 = vcombine.low %v81_v46, %v81_v46 }
  0x5c   :  { %896 = vmatpush1.bf16.msra.mxu0 %v2780_v18  ;;  %978 = vmatpush1.bf16.msra.mxu1 %v2781_v19  ;;  %v2830_v54 = vld [vmem:[#allocation5 + $0x1a4] ss:$16 sps:$4 sm:$0xff]   ;;  %v2832_v55 = vld [vmem:[#allocation5 + $0x1ac] ss:$16 sps:$4 sm:$0xff]   ;;  %v2834_v56 = vld [vmem:[#allocation5 + $0x1a0] ss:$16 sps:$4 sm:$0xff]  }
  0x5d   :  { %897 = vmatprep.subr.bf16.mxu0 %v2782_v20  ;;  %979 = vmatprep.subr.bf16.mxu1 %v2784_v21  ;;  %v2835_v57 = vld [vmem:[#allocation5 + $0x1a8] ss:$16 sps:$4 sm:$0xff]   ;;  %v2836_v58 = vld [vmem:[#allocation5 + $0x1c4] ss:$16 sps:$4 sm:$0xff]   ;;  %v2838_v59 = vld [vmem:[#allocation5 + $0x1cc] ss:$16 sps:$4 sm:$0xff]  }
  0x5e   :  { %919 = vmatprep.mubr.bf16.mxu0 %v2383_v48  ;;  %1001 = vmatprep.mubr.bf16.mxu1 %v2383_v48  ;;  %v2840_v60 = vld [vmem:[#allocation5 + $0x1c0] ss:$16 sps:$4 sm:$0xff]   ;;  %v2841_v61 = vld [vmem:[#allocation5 + $0x1c8] ss:$16 sps:$4 sm:$0xff]   ;;  %v2842_v62 = vld [vmem:[#allocation5 + $0x1e4] ss:$16 sps:$4 sm:$0xff]  }
  0x5f   :  { %v2844_v63 = vld [vmem:[#allocation5 + $0x1ec] ss:$16 sps:$4 sm:$0xff]   ;;  %v2846_v0 = vld [vmem:[#allocation5 + $0x1e0] ss:$16 sps:$4 sm:$0xff]   ;;  %v2847_v1 = vld [vmem:[#allocation5 + $0x1e8] ss:$16 sps:$4 sm:$0xff]  }
  0x60   :  { %898 = vmatpush1.bf16.msra.mxu0 %v2786_v22  ;;  %980 = vmatpush1.bf16.msra.mxu1 %v2787_v23  ;;  %v2852_v2 = vld [vmem:[#allocation5 + $0x204] ss:$16 sps:$4 sm:$0xff]   ;;  %v2855_v3 = vld [vmem:[#allocation5 + $0x20c] ss:$16 sps:$4 sm:$0xff]   ;;  %v2850_v5 = vld [vmem:[#allocation5 + $0x200] ss:$16 sps:$4 sm:$0xff]  }
  0x61   :  { %899 = vmatprep.subr.bf16.mxu0 %v2788_v24  ;;  %981 = vmatprep.subr.bf16.mxu1 %v2790_v25  ;;  %v2853_v6 = vld [vmem:[#allocation5 + $0x208] ss:$16 sps:$4 sm:$0xff]   ;;  %v2858_v7 = vld [vmem:[#allocation5 + $0x224] ss:$16 sps:$4 sm:$0xff]   ;;  %v2861_v8 = vld [vmem:[#allocation5 + $0x22c] ss:$16 sps:$4 sm:$0xff]  }
  0x62   :  { %v2856_v9 = vld [vmem:[#allocation5 + $0x220] ss:$16 sps:$4 sm:$0xff]   ;;  %v2859_v10 = vld [vmem:[#allocation5 + $0x228] ss:$16 sps:$4 sm:$0xff]   ;;  %v2864_v11 = vld [vmem:[#allocation5 + $0x244] ss:$16 sps:$4 sm:$0xff]  }
  0x63   :  { %v2867_v12 = vld [vmem:[#allocation5 + $0x24c] ss:$16 sps:$4 sm:$0xff]   ;;  %v2862_v13 = vld [vmem:[#allocation5 + $0x240] ss:$16 sps:$4 sm:$0xff]   ;;  %v2865_v14 = vld [vmem:[#allocation5 + $0x248] ss:$16 sps:$4 sm:$0xff]  }
  0x64   :  { %900 = vmatpush1.bf16.msra.mxu0 %v2792_v26  ;;  %982 = vmatpush1.bf16.msra.mxu1 %v2793_v27  ;;  %v2870_v15 = vld [vmem:[#allocation5 + $0x264] ss:$16 sps:$4 sm:$0xff]   ;;  %v2873_v16 = vld [vmem:[#allocation5 + $0x26c] ss:$16 sps:$4 sm:$0xff]   ;;  %v2868_v17 = vld [vmem:[#allocation5 + $0x260] ss:$16 sps:$4 sm:$0xff]  }
  0x65   :  { %901 = vmatprep.subr.bf16.mxu0 %v2794_v28  ;;  %983 = vmatprep.subr.bf16.mxu1 %v2796_v29  ;;  %v2871_v18 = vld [vmem:[#allocation5 + $0x268] ss:$16 sps:$4 sm:$0xff]   ;;  %v2876_v19 = vld [vmem:[#allocation5 + $0x284] ss:$16 sps:$4 sm:$0xff]   ;;  %v2879_v20 = vld [vmem:[#allocation5 + $0x28c] ss:$16 sps:$4 sm:$0xff]  }
  0x66   :  { %v2874_v21 = vld [vmem:[#allocation5 + $0x280] ss:$16 sps:$4 sm:$0xff]   ;;  %v2877_v22 = vld [vmem:[#allocation5 + $0x288] ss:$16 sps:$4 sm:$0xff]   ;;  %v2882_v23 = vld [vmem:[#allocation5 + $0x2a4] ss:$16 sps:$4 sm:$0xff]  }
  0x67   :  { %v2885_v24 = vld [vmem:[#allocation5 + $0x2ac] ss:$16 sps:$4 sm:$0xff]   ;;  %v2880_v25 = vld [vmem:[#allocation5 + $0x2a0] ss:$16 sps:$4 sm:$0xff]   ;;  %v2883_v26 = vld [vmem:[#allocation5 + $0x2a8] ss:$16 sps:$4 sm:$0xff]  }
  0x68   :  { %902 = vmatpush1.bf16.msra.mxu0 %v2798_v30  ;;  %984 = vmatpush1.bf16.msra.mxu1 %v2799_v31  ;;  %v2888_v27 = vld [vmem:[#allocation5 + $0x2c4] ss:$16 sps:$4 sm:$0xff]   ;;  %v2891_v28 = vld [vmem:[#allocation5 + $0x2cc] ss:$16 sps:$4 sm:$0xff]   ;;  %v2886_v31 = vld [vmem:[#allocation5 + $0x2c0] ss:$16 sps:$4 sm:$0xff]  }
  0x69   :  { %903 = vmatprep.subr.bf16.mxu0 %v2800_v32  ;;  %985 = vmatprep.subr.bf16.mxu1 %v2802_v33  ;;  %v3393_v29 = vld [vmem:[#allocation2 + $0x8] sm:$0xff]  ;;  %v2894_v33 = vld [vmem:[#allocation5 + $0x2e4] ss:$16 sps:$4 sm:$0xff]   ;;  %s2371_s30 = sshll.u32 %s3298_s29, 4  ;;  %s2372_s30 = int_to_ptr.vmem [resolvable:$true] %s2371_s30 }
  0x6a   :  { %v2385_v30 = vcombine.high %v3393_v29, %v3393_v29  ;;  %v2889_v32 = vld [vmem:[#allocation5 + $0x2c8] ss:$16 sps:$4 sm:$0xff]   ;;  %v2915_v46 = vld [vmem:[#allocation5 + $0x34c] ss:$16 sps:$4 sm:$0xff]   ;;  %s3260_s8 = scalar_lea.vmem %s2372_s30, 128  ;;  %p3265_p5 = scmp.lt.s32.totalorder %s2372_s30, %s2372_s30 }
  0x6b   :  { %v2913_v48 = vld [vmem:[#allocation5 + $0x348] ss:$16 sps:$4 sm:$0xff]   ;;  %p3261_p4 = scmp.ne.s32.totalorder %s2372_s30, %s3260_s8  ;;  %p3266_p6 = scmp.lt.s32.totalorder %s3260_s8, %s3260_s8 }
  0x6c   :  { %904 = vmatpush1.bf16.msra.mxu0 %v2804_v34  ;;  %986 = vmatpush1.bf16.msra.mxu1 %v2805_v35  ;;  %v2897_v34 = vld [vmem:[#allocation5 + $0x2ec] ss:$16 sps:$4 sm:$0xff]   ;;  %v2892_v35 = vld [vmem:[#allocation5 + $0x2e0] ss:$16 sps:$4 sm:$0xff]  }
  0x6d   :  { %905 = vmatprep.subr.bf16.mxu0 %v2806_v36  ;;  %987 = vmatprep.subr.bf16.mxu1 %v2808_v37  ;;  %v2895_v36 = vld [vmem:[#allocation5 + $0x2e8] ss:$16 sps:$4 sm:$0xff]   ;;  %v2900_v37 = vld [vmem:[#allocation5 + $0x304] ss:$16 sps:$4 sm:$0xff]   ;;  %p3267_p7 = por %p3266_p6, %p3265_p5 }
  0x6f   :  { %p3268_p8 = pnand %p3267_p7, %p3261_p4 }
  0x70   :  { %906 = vmatpush1.bf16.msra.mxu0 %v2810_v38  ;;  %988 = vmatpush1.bf16.msra.mxu1 %v2811_v39  ;;  %v2903_v38 = vld [vmem:[#allocation5 + $0x30c] ss:$16 sps:$4 sm:$0xff]   ;;  %v2898_v39 = vld [vmem:[#allocation5 + $0x300] ss:$16 sps:$4 sm:$0xff]  }
  0x71   :  { %907 = vmatprep.subr.bf16.mxu0 %v2812_v40  ;;  %989 = vmatprep.subr.bf16.mxu1 %v2814_v41  ;;  %v2901_v40 = vld [vmem:[#allocation5 + $0x308] ss:$16 sps:$4 sm:$0xff]   ;;  %v2906_v41 = vld [vmem:[#allocation5 + $0x324] ss:$16 sps:$4 sm:$0xff]  }
  0x74   :  { %908 = vmatpush1.bf16.msra.mxu0 %v2816_v42  ;;  %990 = vmatpush1.bf16.msra.mxu1 %v2817_v43  ;;  %v2909_v42 = vld [vmem:[#allocation5 + $0x32c] ss:$16 sps:$4 sm:$0xff]   ;;  %v2904_v43 = vld [vmem:[#allocation5 + $0x320] ss:$16 sps:$4 sm:$0xff]  }
  0x75   :  { %909 = vmatprep.subr.bf16.mxu0 %v2818_v44  ;;  %991 = vmatprep.subr.bf16.mxu1 %v2820_v45  ;;  %v2907_v44 = vld [vmem:[#allocation5 + $0x328] ss:$16 sps:$4 sm:$0xff]   ;;  %v2912_v45 = vld [vmem:[#allocation5 + $0x344] ss:$16 sps:$4 sm:$0xff]  }
  0x78   :  { %910 = vmatpush1.bf16.msra.mxu0 %v2822_v47  ;;  %992 = vmatpush1.bf16.msra.mxu1 %v2823_v49  ;;  %v2910_v47 = vld [vmem:[#allocation5 + $0x340] ss:$16 sps:$4 sm:$0xff]   ;;  %v2918_v49 = vld [vmem:[#allocation5 + $0x364] ss:$16 sps:$4 sm:$0xff]  }
  0x79   :  { %911 = vmatprep.subr.bf16.mxu0 %v2824_v50  ;;  %993 = vmatprep.subr.bf16.mxu1 %v2826_v51  ;;  %v2921_v50 = vld [vmem:[#allocation5 + $0x36c] ss:$16 sps:$4 sm:$0xff]   ;;  %v2916_v51 = vld [vmem:[#allocation5 + $0x360] ss:$16 sps:$4 sm:$0xff]  }
  0x7c   :  { %912 = vmatpush1.bf16.msra.mxu0 %v2828_v52  ;;  %994 = vmatpush1.bf16.msra.mxu1 %v2829_v53  ;;  %v2919_v52 = vld [vmem:[#allocation5 + $0x368] ss:$16 sps:$4 sm:$0xff]   ;;  %v2924_v53 = vld [vmem:[#allocation5 + $0x384] ss:$16 sps:$4 sm:$0xff]  }
  0x7d   :  { %913 = vmatprep.subr.bf16.mxu0 %v2830_v54  ;;  %995 = vmatprep.subr.bf16.mxu1 %v2832_v55  ;;  %v2927_v54 = vld [vmem:[#allocation5 + $0x38c] ss:$16 sps:$4 sm:$0xff]   ;;  %v2922_v55 = vld [vmem:[#allocation5 + $0x380] ss:$16 sps:$4 sm:$0xff]  }
  0x80   :  { %914 = vmatpush1.bf16.msra.mxu0 %v2834_v56  ;;  %996 = vmatpush1.bf16.msra.mxu1 %v2835_v57  ;;  %v2925_v56 = vld [vmem:[#allocation5 + $0x388] ss:$16 sps:$4 sm:$0xff]   ;;  %v2930_v57 = vld [vmem:[#allocation5 + $0x3a4] ss:$16 sps:$4 sm:$0xff]  }
  0x81   :  { %915 = vmatprep.subr.bf16.mxu0 %v2836_v58  ;;  %997 = vmatprep.subr.bf16.mxu1 %v2838_v59  ;;  %v2933_v58 = vld [vmem:[#allocation5 + $0x3ac] ss:$16 sps:$4 sm:$0xff]   ;;  %v2928_v59 = vld [vmem:[#allocation5 + $0x3a0] ss:$16 sps:$4 sm:$0xff]  }
  0x84   :  { %916 = vmatpush1.bf16.msra.mxu0 %v2840_v60  ;;  %998 = vmatpush1.bf16.msra.mxu1 %v2841_v61  ;;  %v2931_v60 = vld [vmem:[#allocation5 + $0x3a8] ss:$16 sps:$4 sm:$0xff]   ;;  %v2936_v61 = vld [vmem:[#allocation5 + $0x3c4] ss:$16 sps:$4 sm:$0xff]  }
  0x85   :  { %917 = vmatprep.subr.bf16.mxu0 %v2842_v62  ;;  %999 = vmatprep.subr.bf16.mxu1 %v2844_v63  ;;  %v2939_v62 = vld [vmem:[#allocation5 + $0x3cc] ss:$16 sps:$4 sm:$0xff]   ;;  %v2934_v63 = vld [vmem:[#allocation5 + $0x3c0] ss:$16 sps:$4 sm:$0xff]  }
  0x88   :  { %918 = vmatpush1.bf16.msra.mxu0 %v2846_v0  ;;  %1000 = vmatpush1.bf16.msra.mxu1 %v2847_v1  ;;  %v2937_v0 = vld [vmem:[#allocation5 + $0x3c8] ss:$16 sps:$4 sm:$0xff]   ;;  %v2942_v1 = vld [vmem:[#allocation5 + $0x3e4] ss:$16 sps:$4 sm:$0xff]  }
  0x89   :  { %928 = vmatprep.subr.bf16.mxu0 %v2852_v2  ;;  %1010 = vmatprep.subr.bf16.mxu1 %v2855_v3  ;;  %v2945_v2 = vld [vmem:[#allocation5 + $0x3ec] ss:$16 sps:$4 sm:$0xff]   ;;  %v2940_v3 = vld [vmem:[#allocation5 + $0x3e0] ss:$16 sps:$4 sm:$0xff]  }
  0x8b   :  { %920 = vmatmul.mubr.bf16.vlgmr.msra.gmra.mrb[0].mxu0 %v2382_v4  ;;  %1002 = vmatmul.mubr.bf16.vlgmr.msra.gmra.mrb[0].mxu1 %v2382_v4  ;;  %v2943_v4 = vld [vmem:[#allocation5 + $0x3e8] ss:$16 sps:$4 sm:$0xff]  }
  0x8c   :  { %929 = vmatpush1.bf16.msra.mxu0 %v2850_v5  ;;  %1011 = vmatpush1.bf16.msra.mxu1 %v2853_v6  ;;  %v2950_v5 = vld [vmem:[#allocation7 + $0x4] ss:$16 sps:$4 sm:$0xff]   ;;  %v2953_v6 = vld [vmem:[#allocation7 + $0xc] ss:$16 sps:$4 sm:$0xff]  }
  0x8d   :  { %930 = vmatprep.subr.bf16.mxu0 %v2858_v7  ;;  %1012 = vmatprep.subr.bf16.mxu1 %v2861_v8  ;;  %v2948_v7 = vld [vmem:[#allocation7] ss:$16 sps:$4 sm:$0xff]   ;;  %v2951_v8 = vld [vmem:[#allocation7 + $0x8] ss:$16 sps:$4 sm:$0xff]  }
  0x8e   :  { %960 = vmatprep.mubr.bf16.mxu0 %v2385_v30  ;;  %1042 = vmatprep.mubr.bf16.mxu1 %v2385_v30  ;;  %v2986_v30 = vld [vmem:[#allocation7 + $0xc4] ss:$16 sps:$4 sm:$0xff]  }
  0x90   :  { %931 = vmatpush1.bf16.msra.mxu0 %v2856_v9  ;;  %1013 = vmatpush1.bf16.msra.mxu1 %v2859_v10  ;;  %v2384_v9 = vcombine.low %v3393_v29, %v3393_v29  ;;  %v2956_v10 = vld [vmem:[#allocation7 + $0x24] ss:$16 sps:$4 sm:$0xff]   ;;  %v2981_v29 = vld [vmem:[#allocation7 + $0xa8] ss:$16 sps:$4 sm:$0xff]  }
  0x91   :  { %932 = vmatprep.subr.bf16.mxu0 %v2864_v11  ;;  %1014 = vmatprep.subr.bf16.mxu1 %v2867_v12  ;;  %v2959_v11 = vld [vmem:[#allocation7 + $0x2c] ss:$16 sps:$4 sm:$0xff]   ;;  %v2954_v12 = vld [vmem:[#allocation7 + $0x20] ss:$16 sps:$4 sm:$0xff]  }
  0x94   :  { %933 = vmatpush1.bf16.msra.mxu0 %v2862_v13  ;;  %1015 = vmatpush1.bf16.msra.mxu1 %v2865_v14  ;;  %v2957_v13 = vld [vmem:[#allocation7 + $0x28] ss:$16 sps:$4 sm:$0xff]   ;;  %v2962_v14 = vld [vmem:[#allocation7 + $0x44] ss:$16 sps:$4 sm:$0xff]  }
  0x95   :  { %934 = vmatprep.subr.bf16.mxu0 %v2870_v15  ;;  %1016 = vmatprep.subr.bf16.mxu1 %v2873_v16  ;;  %v2965_v15 = vld [vmem:[#allocation7 + $0x4c] ss:$16 sps:$4 sm:$0xff]   ;;  %v2960_v16 = vld [vmem:[#allocation7 + $0x40] ss:$16 sps:$4 sm:$0xff]  }
  0x98   :  { %935 = vmatpush1.bf16.msra.mxu0 %v2868_v17  ;;  %1017 = vmatpush1.bf16.msra.mxu1 %v2871_v18  ;;  %v2963_v17 = vld [vmem:[#allocation7 + $0x48] ss:$16 sps:$4 sm:$0xff]   ;;  %v2968_v18 = vld [vmem:[#allocation7 + $0x64] ss:$16 sps:$4 sm:$0xff]  }
  0x99   :  { %936 = vmatprep.subr.bf16.mxu0 %v2876_v19  ;;  %1018 = vmatprep.subr.bf16.mxu1 %v2879_v20  ;;  %v2971_v19 = vld [vmem:[#allocation7 + $0x6c] ss:$16 sps:$4 sm:$0xff]   ;;  %v2966_v20 = vld [vmem:[#allocation7 + $0x60] ss:$16 sps:$4 sm:$0xff]  }
  0x9c   :  { %937 = vmatpush1.bf16.msra.mxu0 %v2874_v21  ;;  %1019 = vmatpush1.bf16.msra.mxu1 %v2877_v22  ;;  %v2969_v21 = vld [vmem:[#allocation7 + $0x68] ss:$16 sps:$4 sm:$0xff]   ;;  %v2974_v22 = vld [vmem:[#allocation7 + $0x84] ss:$16 sps:$4 sm:$0xff]  }
  0x9d   :  { %938 = vmatprep.subr.bf16.mxu0 %v2882_v23  ;;  %1020 = vmatprep.subr.bf16.mxu1 %v2885_v24  ;;  %v2977_v23 = vld [vmem:[#allocation7 + $0x8c] ss:$16 sps:$4 sm:$0xff]   ;;  %v2972_v24 = vld [vmem:[#allocation7 + $0x80] ss:$16 sps:$4 sm:$0xff]  }
  0xa0   :  { %939 = vmatpush1.bf16.msra.mxu0 %v2880_v25  ;;  %1021 = vmatpush1.bf16.msra.mxu1 %v2883_v26  ;;  %v2975_v25 = vld [vmem:[#allocation7 + $0x88] ss:$16 sps:$4 sm:$0xff]   ;;  %v2980_v26 = vld [vmem:[#allocation7 + $0xa4] ss:$16 sps:$4 sm:$0xff]  }
  0xa1   :  { %940 = vmatprep.subr.bf16.mxu0 %v2888_v27  ;;  %1022 = vmatprep.subr.bf16.mxu1 %v2891_v28  ;;  %v2983_v27 = vld [vmem:[#allocation7 + $0xac] ss:$16 sps:$4 sm:$0xff]   ;;  %v2978_v28 = vld [vmem:[#allocation7 + $0xa0] ss:$16 sps:$4 sm:$0xff]  }
  0xa4   :  { %941 = vmatpush1.bf16.msra.mxu0 %v2886_v31  ;;  %1023 = vmatpush1.bf16.msra.mxu1 %v2889_v32  ;;  %v2989_v31 = vld [vmem:[#allocation7 + $0xcc] ss:$16 sps:$4 sm:$0xff]   ;;  %v2984_v32 = vld [vmem:[#allocation7 + $0xc0] ss:$16 sps:$4 sm:$0xff]  }
  0xa5   :  { %942 = vmatprep.subr.bf16.mxu0 %v2894_v33  ;;  %1024 = vmatprep.subr.bf16.mxu1 %v2897_v34  ;;  %v2987_v33 = vld [vmem:[#allocation7 + $0xc8] ss:$16 sps:$4 sm:$0xff]   ;;  %v2992_v34 = vld [vmem:[#allocation7 + $0xe4] ss:$16 sps:$4 sm:$0xff]  }
  0xa8   :  { %943 = vmatpush1.bf16.msra.mxu0 %v2892_v35  ;;  %1025 = vmatpush1.bf16.msra.mxu1 %v2895_v36  ;;  %v2995_v35 = vld [vmem:[#allocation7 + $0xec] ss:$16 sps:$4 sm:$0xff]   ;;  %v2990_v36 = vld [vmem:[#allocation7 + $0xe0] ss:$16 sps:$4 sm:$0xff]  }
  0xa9   :  { %944 = vmatprep.subr.bf16.mxu0 %v2900_v37  ;;  %1026 = vmatprep.subr.bf16.mxu1 %v2903_v38  ;;  %v2993_v37 = vld [vmem:[#allocation7 + $0xe8] ss:$16 sps:$4 sm:$0xff]   ;;  %v2998_v38 = vld [vmem:[#allocation7 + $0x104] ss:$16 sps:$4 sm:$0xff]  }
  0xac   :  { %945 = vmatpush1.bf16.msra.mxu0 %v2898_v39  ;;  %1027 = vmatpush1.bf16.msra.mxu1 %v2901_v40  ;;  %v3001_v39 = vld [vmem:[#allocation7 + $0x10c] ss:$16 sps:$4 sm:$0xff]   ;;  %v2996_v40 = vld [vmem:[#allocation7 + $0x100] ss:$16 sps:$4 sm:$0xff]  }
  0xad   :  { %946 = vmatprep.subr.bf16.mxu0 %v2906_v41  ;;  %1028 = vmatprep.subr.bf16.mxu1 %v2909_v42  ;;  %v2999_v41 = vld [vmem:[#allocation7 + $0x108] ss:$16 sps:$4 sm:$0xff]   ;;  %v3004_v42 = vld [vmem:[#allocation7 + $0x124] ss:$16 sps:$4 sm:$0xff]  }
  0xb0   :  { %947 = vmatpush1.bf16.msra.mxu0 %v2904_v43  ;;  %1029 = vmatpush1.bf16.msra.mxu1 %v2907_v44  ;;  %v3007_v43 = vld [vmem:[#allocation7 + $0x12c] ss:$16 sps:$4 sm:$0xff]   ;;  %v3002_v44 = vld [vmem:[#allocation7 + $0x120] ss:$16 sps:$4 sm:$0xff]  }
  0xb1   :  { %948 = vmatprep.subr.bf16.mxu0 %v2912_v45  ;;  %1030 = vmatprep.subr.bf16.mxu1 %v2915_v46  ;;  %v3005_v45 = vld [vmem:[#allocation7 + $0x128] ss:$16 sps:$4 sm:$0xff]   ;;  %v3010_v46 = vld [vmem:[#allocation7 + $0x144] ss:$16 sps:$4 sm:$0xff]  }
  0xb4   :  { %949 = vmatpush1.bf16.msra.mxu0 %v2910_v47  ;;  %1031 = vmatpush1.bf16.msra.mxu1 %v2913_v48  ;;  %v3013_v47 = vld [vmem:[#allocation7 + $0x14c] ss:$16 sps:$4 sm:$0xff]   ;;  %v3008_v48 = vld [vmem:[#allocation7 + $0x140] ss:$16 sps:$4 sm:$0xff]  }
  0xb5   :  { %950 = vmatprep.subr.bf16.mxu0 %v2918_v49  ;;  %1032 = vmatprep.subr.bf16.mxu1 %v2921_v50  ;;  %v3011_v49 = vld [vmem:[#allocation7 + $0x148] ss:$16 sps:$4 sm:$0xff]   ;;  %v3016_v50 = vld [vmem:[#allocation7 + $0x164] ss:$16 sps:$4 sm:$0xff]  }
  0xb8   :  { %951 = vmatpush1.bf16.msra.mxu0 %v2916_v51  ;;  %1033 = vmatpush1.bf16.msra.mxu1 %v2919_v52  ;;  %v3019_v51 = vld [vmem:[#allocation7 + $0x16c] ss:$16 sps:$4 sm:$0xff]   ;;  %v3014_v52 = vld [vmem:[#allocation7 + $0x160] ss:$16 sps:$4 sm:$0xff]  }
  0xb9   :  { %952 = vmatprep.subr.bf16.mxu0 %v2924_v53  ;;  %1034 = vmatprep.subr.bf16.mxu1 %v2927_v54  ;;  %v3017_v53 = vld [vmem:[#allocation7 + $0x168] ss:$16 sps:$4 sm:$0xff]   ;;  %v3022_v54 = vld [vmem:[#allocation7 + $0x184] ss:$16 sps:$4 sm:$0xff]  }
  0xbc   :  { %953 = vmatpush1.bf16.msra.mxu0 %v2922_v55  ;;  %1035 = vmatpush1.bf16.msra.mxu1 %v2925_v56  ;;  %v3025_v55 = vld [vmem:[#allocation7 + $0x18c] ss:$16 sps:$4 sm:$0xff]   ;;  %v3020_v56 = vld [vmem:[#allocation7 + $0x180] ss:$16 sps:$4 sm:$0xff]  }
  0xbd   :  { %954 = vmatprep.subr.bf16.mxu0 %v2930_v57  ;;  %1036 = vmatprep.subr.bf16.mxu1 %v2933_v58  ;;  %v3023_v57 = vld [vmem:[#allocation7 + $0x188] ss:$16 sps:$4 sm:$0xff]   ;;  %v3028_v58 = vld [vmem:[#allocation7 + $0x1a4] ss:$16 sps:$4 sm:$0xff]  }
  0xc0   :  { %955 = vmatpush1.bf16.msra.mxu0 %v2928_v59  ;;  %1037 = vmatpush1.bf16.msra.mxu1 %v2931_v60  ;;  %v3031_v59 = vld [vmem:[#allocation7 + $0x1ac] ss:$16 sps:$4 sm:$0xff]   ;;  %v3026_v60 = vld [vmem:[#allocation7 + $0x1a0] ss:$16 sps:$4 sm:$0xff]  }
  0xc1   :  { %956 = vmatprep.subr.bf16.mxu0 %v2936_v61  ;;  %1038 = vmatprep.subr.bf16.mxu1 %v2939_v62  ;;  %v3029_v61 = vld [vmem:[#allocation7 + $0x1a8] ss:$16 sps:$4 sm:$0xff]   ;;  %v3034_v62 = vld [vmem:[#allocation7 + $0x1c4] ss:$16 sps:$4 sm:$0xff]  }
  0xc4   :  { %957 = vmatpush1.bf16.msra.mxu0 %v2934_v63  ;;  %1039 = vmatpush1.bf16.msra.mxu1 %v2937_v0  ;;  %v3037_v63 = vld [vmem:[#allocation7 + $0x1cc] ss:$16 sps:$4 sm:$0xff]   ;;  %v3032_v0 = vld [vmem:[#allocation7 + $0x1c0] ss:$16 sps:$4 sm:$0xff]  }
  0xc5   :  { %958 = vmatprep.subr.bf16.mxu0 %v2942_v1  ;;  %1040 = vmatprep.subr.bf16.mxu1 %v2945_v2  ;;  %v3035_v1 = vld [vmem:[#allocation7 + $0x1c8] ss:$16 sps:$4 sm:$0xff]   ;;  %v3040_v2 = vld [vmem:[#allocation7 + $0x1e4] ss:$16 sps:$4 sm:$0xff]  }
  0xc8   :  { %959 = vmatpush1.bf16.msra.mxu0 %v2940_v3  ;;  %1041 = vmatpush1.bf16.msra.mxu1 %v2943_v4  ;;  %v3043_v3 = vld [vmem:[#allocation7 + $0x1ec] ss:$16 sps:$4 sm:$0xff]   ;;  %v3038_v4 = vld [vmem:[#allocation7 + $0x1e0] ss:$16 sps:$4 sm:$0xff]  }
  0xc9   :  { %1849 = vmatprep.subr.bf16.mxu0 %v2950_v5  ;;  %1931 = vmatprep.subr.bf16.mxu1 %v2953_v6  ;;  %v3041_v5 = vld [vmem:[#allocation7 + $0x1e8] ss:$16 sps:$4 sm:$0xff]   ;;  %v3046_v6 = vld [vmem:[#allocation7 + $0x204] ss:$16 sps:$4 sm:$0xff]  }
  0xcb   :  { %961 = vmatmul.mubr.bf16.vlgmr.msra.gmra.mrb[0].mxu0 %v2384_v9  ;;  %1043 = vmatmul.mubr.bf16.vlgmr.msra.gmra.mrb[0].mxu1 %v2384_v9 }
  0xcc   :  { %1850 = vmatpush1.bf16.msra.mxu0 %v2948_v7  ;;  %1932 = vmatpush1.bf16.msra.mxu1 %v2951_v8  ;;  %v3049_v7 = vld [vmem:[#allocation7 + $0x20c] ss:$16 sps:$4 sm:$0xff]   ;;  %v213_v8 = vlaneseq }
  0xcd   :  { %1851 = vmatprep.subr.bf16.mxu0 %v2956_v10  ;;  %1933 = vmatprep.subr.bf16.mxu1 %v2959_v11  ;;  %v3405_v11 = vld [vmem:[%s3453_s2] sm:$0xf] }
  0xce   :  { %v3399_v9 = vshrl.u32 %v213_v8, 7  ;;  %v3106_v8 = vld [vmem:[#allocation7 + $0x344] ss:$16 sps:$4 sm:$0xff]  }
  0xd0   :  { %1852 = vmatpush1.bf16.msra.mxu0 %v2954_v12  ;;  %1934 = vmatpush1.bf16.msra.mxu1 %v2957_v13  ;;  %v215_v10 = vsub.s32 0, %v3399_v9  ;;  %v219_v12 = vsub.s32 1, %v3399_v9  ;;  %v227_v13 = vsub.s32 3, %v3399_v9 }
  0xd1   :  { %1853 = vmatprep.subr.bf16.mxu0 %v2962_v14  ;;  %1935 = vmatprep.subr.bf16.mxu1 %v2965_v15 }
  0xd2   :  { %v216_v14 = vrot.slane %v3405_v11, %v215_v10  ;;  %v220_v15 = vrot.slane %v3405_v11, %v219_v12 }
  0xd4   :  { %1854 = vmatpush1.bf16.msra.mxu0 %v2960_v16  ;;  %1936 = vmatpush1.bf16.msra.mxu1 %v2963_v17  ;;  %v228_v16 = vrot.slane %v3405_v11, %v227_v13 }
  0xd5   :  { %1855 = vmatprep.subr.bf16.mxu0 %v2968_v18  ;;  %1937 = vmatprep.subr.bf16.mxu1 %v2971_v19 }
  0xd8   :  { %1856 = vmatpush1.bf16.msra.mxu0 %v2966_v20  ;;  %1938 = vmatpush1.bf16.msra.mxu1 %v2969_v21 }
  0xd9   :  { %1857 = vmatprep.subr.bf16.mxu0 %v2974_v22  ;;  %1939 = vmatprep.subr.bf16.mxu1 %v2977_v23 }
  0xdc   :  { %1858 = vmatpush1.bf16.msra.mxu0 %v2972_v24  ;;  %1940 = vmatpush1.bf16.msra.mxu1 %v2975_v25 }
  0xdd   :  { %1859 = vmatprep.subr.bf16.mxu0 %v2980_v26  ;;  %1941 = vmatprep.subr.bf16.mxu1 %v2983_v27 }
  0xe0   :  { %1860 = vmatpush1.bf16.msra.mxu0 %v2978_v28  ;;  %1942 = vmatpush1.bf16.msra.mxu1 %v2981_v29 }
  0xe1   :  { %1861 = vmatprep.subr.bf16.mxu0 %v2986_v30  ;;  %1943 = vmatprep.subr.bf16.mxu1 %v2989_v31 }
  0xe4   :  { %1862 = vmatpush1.bf16.msra.mxu0 %v2984_v32  ;;  %1944 = vmatpush1.bf16.msra.mxu1 %v2987_v33  ;;  %v3044_v32 = vld [vmem:[#allocation7 + $0x200] ss:$16 sps:$4 sm:$0xff]   ;;  %v3047_v33 = vld [vmem:[#allocation7 + $0x208] ss:$16 sps:$4 sm:$0xff]  }
  0xe5   :  { %1863 = vmatprep.subr.bf16.mxu0 %v2992_v34  ;;  %1945 = vmatprep.subr.bf16.mxu1 %v2995_v35  ;;  %v3052_v35 = vld [vmem:[#allocation7 + $0x224] ss:$16 sps:$4 sm:$0xff]  }
  0xe8   :  { %1864 = vmatpush1.bf16.msra.mxu0 %v2990_v36  ;;  %1946 = vmatpush1.bf16.msra.mxu1 %v2993_v37  ;;  %v3055_v36 = vld [vmem:[#allocation7 + $0x22c] ss:$16 sps:$4 sm:$0xff]  }
  0xe9   :  { %1865 = vmatprep.subr.bf16.mxu0 %v2998_v38  ;;  %1947 = vmatprep.subr.bf16.mxu1 %v3001_v39  ;;  %v3050_v38 = vld [vmem:[#allocation7 + $0x220] ss:$16 sps:$4 sm:$0xff]   ;;  %v3053_v39 = vld [vmem:[#allocation7 + $0x228] ss:$16 sps:$4 sm:$0xff]  }
  0xec   :  { %1866 = vmatpush1.bf16.msra.mxu0 %v2996_v40  ;;  %1948 = vmatpush1.bf16.msra.mxu1 %v2999_v41  ;;  %v3058_v40 = vld [vmem:[#allocation7 + $0x244] ss:$16 sps:$4 sm:$0xff]   ;;  %v3061_v41 = vld [vmem:[#allocation7 + $0x24c] ss:$16 sps:$4 sm:$0xff]  }
  0xed   :  { %1867 = vmatprep.subr.bf16.mxu0 %v3004_v42  ;;  %1949 = vmatprep.subr.bf16.mxu1 %v3007_v43  ;;  %v3056_v42 = vld [vmem:[#allocation7 + $0x240] ss:$16 sps:$4 sm:$0xff]   ;;  %v3059_v43 = vld [vmem:[#allocation7 + $0x248] ss:$16 sps:$4 sm:$0xff]  }
  0xf0   :  { %1868 = vmatpush1.bf16.msra.mxu0 %v3002_v44  ;;  %1950 = vmatpush1.bf16.msra.mxu1 %v3005_v45  ;;  %v3064_v44 = vld [vmem:[#allocation7 + $0x264] ss:$16 sps:$4 sm:$0xff]   ;;  %v3067_v45 = vld [vmem:[#allocation7 + $0x26c] ss:$16 sps:$4 sm:$0xff]  }
  0xf1   :  { %1869 = vmatprep.subr.bf16.mxu0 %v3010_v46  ;;  %1951 = vmatprep.subr.bf16.mxu1 %v3013_v47  ;;  %v3062_v46 = vld [vmem:[#allocation7 + $0x260] ss:$16 sps:$4 sm:$0xff]   ;;  %v3065_v47 = vld [vmem:[#allocation7 + $0x268] ss:$16 sps:$4 sm:$0xff]  }
  0xf4   :  { %1870 = vmatpush1.bf16.msra.mxu0 %v3008_v48  ;;  %1952 = vmatpush1.bf16.msra.mxu1 %v3011_v49  ;;  %v3070_v48 = vld [vmem:[#allocation7 + $0x284] ss:$16 sps:$4 sm:$0xff]   ;;  %v3073_v49 = vld [vmem:[#allocation7 + $0x28c] ss:$16 sps:$4 sm:$0xff]  }
  0xf5   :  { %1871 = vmatprep.subr.bf16.mxu0 %v3016_v50  ;;  %1953 = vmatprep.subr.bf16.mxu1 %v3019_v51  ;;  %v3068_v50 = vld [vmem:[#allocation7 + $0x280] ss:$16 sps:$4 sm:$0xff]   ;;  %v3071_v51 = vld [vmem:[#allocation7 + $0x288] ss:$16 sps:$4 sm:$0xff]  }
  0xf8   :  { %1872 = vmatpush1.bf16.msra.mxu0 %v3014_v52  ;;  %1954 = vmatpush1.bf16.msra.mxu1 %v3017_v53  ;;  %v3076_v52 = vld [vmem:[#allocation7 + $0x2a4] ss:$16 sps:$4 sm:$0xff]   ;;  %v3079_v53 = vld [vmem:[#allocation7 + $0x2ac] ss:$16 sps:$4 sm:$0xff]  }
  0xf9   :  { %1873 = vmatprep.subr.bf16.mxu0 %v3022_v54  ;;  %1955 = vmatprep.subr.bf16.mxu1 %v3025_v55  ;;  %v3074_v54 = vld [vmem:[#allocation7 + $0x2a0] ss:$16 sps:$4 sm:$0xff]   ;;  %v3077_v55 = vld [vmem:[#allocation7 + $0x2a8] ss:$16 sps:$4 sm:$0xff]  }
  0xfc   :  { %1874 = vmatpush1.bf16.msra.mxu0 %v3020_v56  ;;  %1956 = vmatpush1.bf16.msra.mxu1 %v3023_v57  ;;  %v3082_v56 = vld [vmem:[#allocation7 + $0x2c4] ss:$16 sps:$4 sm:$0xff]   ;;  %v3085_v57 = vld [vmem:[#allocation7 + $0x2cc] ss:$16 sps:$4 sm:$0xff]  }
  0xfd   :  { %1875 = vmatprep.subr.bf16.mxu0 %v3028_v58  ;;  %1957 = vmatprep.subr.bf16.mxu1 %v3031_v59  ;;  %v3080_v58 = vld [vmem:[#allocation7 + $0x2c0] ss:$16 sps:$4 sm:$0xff]   ;;  %v3083_v59 = vld [vmem:[#allocation7 + $0x2c8] ss:$16 sps:$4 sm:$0xff]  }
 0x100   :  { %1876 = vmatpush1.bf16.msra.mxu0 %v3026_v60  ;;  %1958 = vmatpush1.bf16.msra.mxu1 %v3029_v61  ;;  %v3088_v60 = vld [vmem:[#allocation7 + $0x2e4] ss:$16 sps:$4 sm:$0xff]   ;;  %v3091_v61 = vld [vmem:[#allocation7 + $0x2ec] ss:$16 sps:$4 sm:$0xff]  }
 0x101   :  { %1877 = vmatprep.subr.bf16.mxu0 %v3034_v62  ;;  %1959 = vmatprep.subr.bf16.mxu1 %v3037_v63  ;;  %v3086_v62 = vld [vmem:[#allocation7 + $0x2e0] ss:$16 sps:$4 sm:$0xff]   ;;  %v3089_v63 = vld [vmem:[#allocation7 + $0x2e8] ss:$16 sps:$4 sm:$0xff]  }
 0x104   :  { %1878 = vmatpush1.bf16.msra.mxu0 %v3032_v0  ;;  %1960 = vmatpush1.bf16.msra.mxu1 %v3035_v1  ;;  %v3094_v0 = vld [vmem:[#allocation7 + $0x304] ss:$16 sps:$4 sm:$0xff]   ;;  %v3097_v1 = vld [vmem:[#allocation7 + $0x30c] ss:$16 sps:$4 sm:$0xff]  }
 0x105   :  { %1879 = vmatprep.subr.bf16.mxu0 %v3040_v2  ;;  %1961 = vmatprep.subr.bf16.mxu1 %v3043_v3  ;;  %v3092_v2 = vld [vmem:[#allocation7 + $0x300] ss:$16 sps:$4 sm:$0xff]   ;;  %v3095_v3 = vld [vmem:[#allocation7 + $0x308] ss:$16 sps:$4 sm:$0xff]  }
 0x108   :  { %1880 = vmatpush1.bf16.msra.mxu0 %v3038_v4  ;;  %1962 = vmatpush1.bf16.msra.mxu1 %v3041_v5  ;;  %v3100_v4 = vld [vmem:[#allocation7 + $0x324] ss:$16 sps:$4 sm:$0xff]   ;;  %v3103_v5 = vld [vmem:[#allocation7 + $0x32c] ss:$16 sps:$4 sm:$0xff]  }
 0x109   :  { %1890 = vmatprep.subr.bf16.mxu0 %v3046_v6  ;;  %1972 = vmatprep.subr.bf16.mxu1 %v3049_v7  ;;  %v3098_v6 = vld [vmem:[#allocation7 + $0x320] ss:$16 sps:$4 sm:$0xff]   ;;  %v3101_v7 = vld [vmem:[#allocation7 + $0x328] ss:$16 sps:$4 sm:$0xff]  }
 0x19e   :  { %v962_v17 = vpop.f32.mrb[0].mxu0  ;;  %v3418_v18 = vpop.f32.mrb[0].mxu1 }
 0x19f   :  { %v2719_v19 = vadd.f32 %v962_v17, %v216_v14  ;;  %v964_v20 = vpop.f32.mrb[1].mxu0  ;;  %v1046_v21 = vpop.f32.mrb[1].mxu1  ;;  %v3109_v14 = vld [vmem:[#allocation7 + $0x34c] ss:$16 sps:$4 sm:$0xff]   ;;  %v3112_v17 = vld [vmem:[#allocation7 + $0x364] ss:$16 sps:$4 sm:$0xff]  }
 0x1a0   :  { %v2720_v22 = vadd.f32 %v964_v20, %v220_v15  ;;  %v2722_v23 = vadd.f32 %v1046_v21, %v228_v16  ;;  %v966_v24 = vpop.f32.mrb[2].mxu0  ;;  %v1048_v25 = vpop.f32.mrb[2].mxu1  ;;  %v3104_v15 = vld [vmem:[#allocation7 + $0x340] ss:$16 sps:$4 sm:$0xff]   ;;  %v3107_v16 = vld [vmem:[#allocation7 + $0x348] ss:$16 sps:$4 sm:$0xff]  }
 0x1a1   :  { %v1051_v26 = vmax.f32 %v2719_v19, 0.0  ;;  %v967_v27 = vpop.f32.mrb[3].mxu0  ;;  %v1049_v28 = vpop.f32.mrb[3].mxu1  ;;  %v3115_v19 = vld [vmem:[#allocation7 + $0x36c] ss:$16 sps:$4 sm:$0xff]  }
 0x1a2   :  { %v1052_v29 = vmax.f32 %v2720_v22, 0.0  ;;  %v1054_v30 = vmax.f32 %v2722_v23, 0.0  ;;  %v3110_v20 = vld [vmem:[#allocation7 + $0x360] ss:$16 sps:$4 sm:$0xff]   ;;  %v3113_v21 = vld [vmem:[#allocation7 + $0x368] ss:$16 sps:$4 sm:$0xff]  }
 0x1a3   :  { %v1055_v34 = vpack.c.bf16 %v1051_v26, %v1051_v26  ;;  %v3118_v22 = vld [vmem:[#allocation7 + $0x384] ss:$16 sps:$4 sm:$0xff]   ;;  %v3121_v23 = vld [vmem:[#allocation7 + $0x38c] ss:$16 sps:$4 sm:$0xff]   ;;  %v3116_v24 = vld [vmem:[#allocation7 + $0x380] ss:$16 sps:$4 sm:$0xff]  }
 0x1a4   :  { %v1056_v31 = vpack.c.bf16 %v1052_v29, %v1052_v29  ;;  %v1058_v37 = vpack.c.bf16 %v1054_v30, %v1054_v30  ;;  %v3119_v25 = vld [vmem:[#allocation7 + $0x388] ss:$16 sps:$4 sm:$0xff]   ;;  %v223_v26 = vsub.s32 2, %v3399_v9  ;;  %v3124_v27 = vld [vmem:[#allocation7 + $0x3a4] ss:$16 sps:$4 sm:$0xff]  }
 0x1a5   :  { %v3127_v28 = vld [vmem:[#allocation7 + $0x3ac] ss:$16 sps:$4 sm:$0xff]   ;;  %v3122_v29 = vld [vmem:[#allocation7 + $0x3a0] ss:$16 sps:$4 sm:$0xff]   ;;  %v3125_v30 = vld [vmem:[#allocation7 + $0x3a8] ss:$16 sps:$4 sm:$0xff]  }
 0x1a6   :  { %1881 = vmatprep.mubr.bf16.mxu0 %v1056_v31  ;;  %1963 = vmatprep.mubr.bf16.mxu1 %v1056_v31  ;;  %v224_v31 = vrot.slane %v3405_v11, %v223_v26  ;;  %v3140_v11 = vld [vmem:[#allocation8 + $0x40] sm:$0xff]  }
 0x1a7   :  { %1882 = vmatmul.mubr.bf16.vlgmr.msra.gmra.mrb[4].mxu0 %v1055_v34  ;;  %1964 = vmatmul.mubr.bf16.vlgmr.msra.gmra.mrb[4].mxu1 %v1055_v34  ;;  %v3128_v34 = vld [vmem:[#allocation7 + $0x3c0] ss:$16 sps:$4 sm:$0xff]  }
 0x1a8   :  { %1891 = vmatpush1.bf16.msra.mxu0 %v3044_v32  ;;  %1973 = vmatpush1.bf16.msra.mxu1 %v3047_v33  ;;  %v3130_v32 = vld [vmem:[#allocation7 + $0x3c4] ss:$16 sps:$4 sm:$0xff]   ;;  %v3133_v33 = vld [vmem:[#allocation7 + $0x3cc] ss:$16 sps:$4 sm:$0xff]  }
 0x1a9   :  { %1922 = vmatprep.mubr.bf16.mxu0 %v1058_v37  ;;  %2004 = vmatprep.mubr.bf16.mxu1 %v1058_v37  ;;  %v3136_v37 = vld [vmem:[#allocation7 + $0x3e4] ss:$16 sps:$4 sm:$0xff]  }
 0x1aa   :  { %1892 = vmatprep.subr.bf16.mxu0 %v3052_v35  ;;  %1974 = vmatprep.subr.bf16.mxu1 %v3055_v36  ;;  %v3131_v35 = vld [vmem:[#allocation7 + $0x3c8] ss:$16 sps:$4 sm:$0xff]   ;;  %v2721_v36 = vadd.f32 %v3418_v18, %v224_v31 }
 0x1ab   :  { %v3144_v18 = vld [vmem:[#allocation8 + $0x48] sm:$0xff]  }
 0x1ac   :  { %1893 = vmatpush1.bf16.msra.mxu0 %v3050_v38  ;;  %1975 = vmatpush1.bf16.msra.mxu1 %v3053_v39  ;;  %v3139_v38 = vld [vmem:[#allocation7 + $0x3ec] ss:$16 sps:$4 sm:$0xff]   ;;  %v3134_v39 = vld [vmem:[#allocation7 + $0x3e0] ss:$16 sps:$4 sm:$0xff]  }
 0x1ad   :  { %1894 = vmatprep.subr.bf16.mxu0 %v3058_v40  ;;  %1976 = vmatprep.subr.bf16.mxu1 %v3061_v41  ;;  %v3137_v40 = vld [vmem:[#allocation7 + $0x3e8] ss:$16 sps:$4 sm:$0xff]   ;;  %v1053_v41 = vmax.f32 %v2721_v36, 0.0 }
 0x1b0   :  { %1895 = vmatpush1.bf16.msra.mxu0 %v3056_v42  ;;  %1977 = vmatpush1.bf16.msra.mxu1 %v3059_v43  ;;  %v3141_v42 = vld [vmem:[#allocation8 + $0xc0] sm:$0xff]  }
 0x1b1   :  { %1896 = vmatprep.subr.bf16.mxu0 %v3064_v44  ;;  %1978 = vmatprep.subr.bf16.mxu1 %v3067_v45  ;;  %v3142_v43 = vld [vmem:[#allocation8] sm:$0xff]   ;;  %v1057_v45 = vpack.c.bf16 %v1053_v41, %v1053_v41 }
 0x1b2   :  { %v3143_v44 = vld [vmem:[#allocation8 + $0x80] sm:$0xff]  }
 0x1b4   :  { %1897 = vmatpush1.bf16.msra.mxu0 %v3062_v46  ;;  %1979 = vmatpush1.bf16.msra.mxu1 %v3065_v47  ;;  %v3145_v46 = vld [vmem:[#allocation8 + $0xc8] sm:$0xff]  }
 0x1b5   :  { %1898 = vmatprep.subr.bf16.mxu0 %v3070_v48  ;;  %1980 = vmatprep.subr.bf16.mxu1 %v3073_v49  ;;  %v3146_v47 = vld [vmem:[#allocation8 + $0x8] sm:$0xff]   ;;  %v3148_v49 = vld [vmem:[#allocation8 + $0x50] sm:$0xff]  }
 0x1b6   :  { %v3147_v48 = vld [vmem:[#allocation8 + $0x88] sm:$0xff]  }
 0x1b8   :  { %1899 = vmatpush1.bf16.msra.mxu0 %v3068_v50  ;;  %1981 = vmatpush1.bf16.msra.mxu1 %v3071_v51  ;;  %v3149_v50 = vld [vmem:[#allocation8 + $0xd0] sm:$0xff]  }
 0x1b9   :  { %1900 = vmatprep.subr.bf16.mxu0 %v3076_v52  ;;  %1982 = vmatprep.subr.bf16.mxu1 %v3079_v53  ;;  %v3150_v51 = vld [vmem:[#allocation8 + $0x10] sm:$0xff]   ;;  %v3152_v53 = vld [vmem:[#allocation8 + $0x58] sm:$0xff]  }
 0x1ba   :  { %v3151_v52 = vld [vmem:[#allocation8 + $0x90] sm:$0xff]  }
 0x1bc   :  { %1901 = vmatpush1.bf16.msra.mxu0 %v3074_v54  ;;  %1983 = vmatpush1.bf16.msra.mxu1 %v3077_v55  ;;  %v3153_v54 = vld [vmem:[#allocation8 + $0xd8] sm:$0xff]  }
 0x1bd   :  { %1902 = vmatprep.subr.bf16.mxu0 %v3082_v56  ;;  %1984 = vmatprep.subr.bf16.mxu1 %v3085_v57  ;;  %v3154_v55 = vld [vmem:[#allocation8 + $0x18] sm:$0xff]   ;;  %v3156_v57 = vld [vmem:[#allocation8 + $0x60] sm:$0xff]  }
 0x1be   :  { %v3155_v56 = vld [vmem:[#allocation8 + $0x98] sm:$0xff]  }
 0x1c0   :  { %1903 = vmatpush1.bf16.msra.mxu0 %v3080_v58  ;;  %1985 = vmatpush1.bf16.msra.mxu1 %v3083_v59  ;;  %v3157_v58 = vld [vmem:[#allocation8 + $0xe0] sm:$0xff]  }
 0x1c1   :  { %1904 = vmatprep.subr.bf16.mxu0 %v3088_v60  ;;  %1986 = vmatprep.subr.bf16.mxu1 %v3091_v61  ;;  %v3158_v59 = vld [vmem:[#allocation8 + $0x20] sm:$0xff]   ;;  %v3160_v61 = vld [vmem:[#allocation8 + $0x68] sm:$0xff]  }
 0x1c2   :  { %v3159_v60 = vld [vmem:[#allocation8 + $0xa0] sm:$0xff]  }
 0x1c4   :  { %1905 = vmatpush1.bf16.msra.mxu0 %v3086_v62  ;;  %1987 = vmatpush1.bf16.msra.mxu1 %v3089_v63  ;;  %v3161_v62 = vld [vmem:[#allocation8 + $0xe8] sm:$0xff]  }
 0x1c5   :  { %1906 = vmatprep.subr.bf16.mxu0 %v3094_v0  ;;  %1988 = vmatprep.subr.bf16.mxu1 %v3097_v1  ;;  %v3162_v63 = vld [vmem:[#allocation8 + $0x28] sm:$0xff]   ;;  %v3164_v1 = vld [vmem:[#allocation8 + $0x70] sm:$0xff]  }
 0x1c6   :  { %v3163_v0 = vld [vmem:[#allocation8 + $0xa8] sm:$0xff]  }
 0x1c8   :  { %1907 = vmatpush1.bf16.msra.mxu0 %v3092_v2  ;;  %1989 = vmatpush1.bf16.msra.mxu1 %v3095_v3  ;;  %v3165_v2 = vld [vmem:[#allocation8 + $0xf0] sm:$0xff]  }
 0x1c9   :  { %1908 = vmatprep.subr.bf16.mxu0 %v3100_v4  ;;  %1990 = vmatprep.subr.bf16.mxu1 %v3103_v5  ;;  %v3166_v3 = vld [vmem:[#allocation8 + $0x30] sm:$0xff]   ;;  %v3168_v5 = vld [vmem:[#allocation8 + $0x78] sm:$0xff]  }
 0x1ca   :  { %v3167_v4 = vld [vmem:[#allocation8 + $0xb0] sm:$0xff]  }
 0x1cc   :  { %1909 = vmatpush1.bf16.msra.mxu0 %v3098_v6  ;;  %1991 = vmatpush1.bf16.msra.mxu1 %v3101_v7  ;;  %v3169_v6 = vld [vmem:[#allocation8 + $0xf8] sm:$0xff]  }
 0x1cd   :  { %1910 = vmatprep.subr.bf16.mxu0 %v3106_v8  ;;  %1992 = vmatprep.subr.bf16.mxu1 %v3109_v14  ;;  %v3170_v7 = vld [vmem:[#allocation8 + $0x38] sm:$0xff]   ;;  %v1187_v14 = vld [vmem:[%s3455_s4] sm:$0xf] }
 0x1ce   :  { %v3171_v8 = vld [vmem:[#allocation8 + $0xb8] sm:$0xff]  }
 0x1d0   :  { %1911 = vmatpush1.bf16.msra.mxu0 %v3104_v15  ;;  %1993 = vmatpush1.bf16.msra.mxu1 %v3107_v16  ;;  %v1192_v15 = vrot.slane %v1187_v14, %v215_v10  ;;  %v1200_v16 = vrot.slane %v1187_v14, %v223_v26 }
 0x1d1   :  { %1912 = vmatprep.subr.bf16.mxu0 %v3112_v17  ;;  %1994 = vmatprep.subr.bf16.mxu1 %v3115_v19  ;;  %v1196_v17 = vrot.slane %v1187_v14, %v219_v12  ;;  %v1204_v19 = vrot.slane %v1187_v14, %v227_v13 }
 0x1d4   :  { %1913 = vmatpush1.bf16.msra.mxu0 %v3110_v20  ;;  %1995 = vmatpush1.bf16.msra.mxu1 %v3113_v21 }
 0x1d5   :  { %1914 = vmatprep.subr.bf16.mxu0 %v3118_v22  ;;  %1996 = vmatprep.subr.bf16.mxu1 %v3121_v23 }
 0x1d8   :  { %1915 = vmatpush1.bf16.msra.mxu0 %v3116_v24  ;;  %1997 = vmatpush1.bf16.msra.mxu1 %v3119_v25 }
 0x1d9   :  { %1916 = vmatprep.subr.bf16.mxu0 %v3124_v27  ;;  %1998 = vmatprep.subr.bf16.mxu1 %v3127_v28 }
 0x1dc   :  { %1917 = vmatpush1.bf16.msra.mxu0 %v3122_v29  ;;  %1999 = vmatpush1.bf16.msra.mxu1 %v3125_v30 }
 0x1dd   :  { %1918 = vmatprep.subr.bf16.mxu0 %v3130_v32  ;;  %2000 = vmatprep.subr.bf16.mxu1 %v3133_v33 }
 0x1e0   :  { %1919 = vmatpush1.bf16.msra.mxu0 %v3128_v34  ;;  %2001 = vmatpush1.bf16.msra.mxu1 %v3131_v35 }
 0x1e1   :  { %1920 = vmatprep.subr.bf16.mxu0 %v3136_v37  ;;  %2002 = vmatprep.subr.bf16.mxu1 %v3139_v38  ;;  %v2642_v38 = vld [vmem:[%s3457_s6] ss:$0 sm:$0xff] }
 0x1e4   :  { %1921 = vmatpush1.bf16.msra.mxu0 %v3134_v39  ;;  %2003 = vmatpush1.bf16.msra.mxu1 %v3137_v40 }
 0x1e5   :  { %2675 = vmatprep.subr.bf16.mxu0 %v3140_v11  ;;  %2697 = vmatprep.subr.bf16.mxu1 %v3141_v42 }
 0x1e7   :  { %1923 = vmatmul.mubr.bf16.vlgmr.msra.gmra.mrb[4].mxu0 %v1057_v45  ;;  %2005 = vmatmul.mubr.bf16.vlgmr.msra.gmra.mrb[4].mxu1 %v1057_v45 }
 0x1e8   :  { %2676 = vmatpush3.bf16.msra.mxu0 %v3142_v43  ;;  %2698 = vmatpush3.bf16.msra.mxu1 %v3143_v44 }
 0x1e9   :  { %2677 = vmatprep.subr.bf16.mxu0 %v3144_v18  ;;  %2699 = vmatprep.subr.bf16.mxu1 %v3145_v46 }
 0x1ec   :  { %2678 = vmatpush3.bf16.msra.mxu0 %v3146_v47  ;;  %2700 = vmatpush3.bf16.msra.mxu1 %v3147_v48 }
 0x1ed   :  { %2679 = vmatprep.subr.bf16.mxu0 %v3148_v49  ;;  %2701 = vmatprep.subr.bf16.mxu1 %v3149_v50 }
 0x1f0   :  { %2680 = vmatpush3.bf16.msra.mxu0 %v3150_v51  ;;  %2702 = vmatpush3.bf16.msra.mxu1 %v3151_v52 }
 0x1f1   :  { %2681 = vmatprep.subr.bf16.mxu0 %v3152_v53  ;;  %2703 = vmatprep.subr.bf16.mxu1 %v3153_v54 }
 0x1f4   :  { %2682 = vmatpush3.bf16.msra.mxu0 %v3154_v55  ;;  %2704 = vmatpush3.bf16.msra.mxu1 %v3155_v56 }
 0x1f5   :  { %2683 = vmatprep.subr.bf16.mxu0 %v3156_v57  ;;  %2705 = vmatprep.subr.bf16.mxu1 %v3157_v58 }
 0x1f8   :  { %2684 = vmatpush3.bf16.msra.mxu0 %v3158_v59  ;;  %2706 = vmatpush3.bf16.msra.mxu1 %v3159_v60 }
 0x1f9   :  { %2685 = vmatprep.subr.bf16.mxu0 %v3160_v61  ;;  %2707 = vmatprep.subr.bf16.mxu1 %v3161_v62 }
 0x1fc   :  { %2686 = vmatpush3.bf16.msra.mxu0 %v3162_v63  ;;  %2708 = vmatpush3.bf16.msra.mxu1 %v3163_v0 }
 0x1fd   :  { %2687 = vmatprep.subr.bf16.mxu0 %v3164_v1  ;;  %2709 = vmatprep.subr.bf16.mxu1 %v3165_v2 }
 0x200   :  { %2688 = vmatpush3.bf16.msra.mxu0 %v3166_v3  ;;  %2710 = vmatpush3.bf16.msra.mxu1 %v3167_v4 }
 0x201   :  { %2689 = vmatprep.subr.bf16.mxu0 %v3168_v5  ;;  %2711 = vmatprep.subr.bf16.mxu1 %v3169_v6 }
 0x204   :  { %2690 = vmatpush3.bf16.msra.mxu0 %v3170_v7  ;;  %2712 = vmatpush3.bf16.msra.mxu1 %v3171_v8 }
 0x2ba   :  { %v1924_v20 = vpop.f32.mrb[4].mxu0  ;;  %v2006_v21 = vpop.f32.mrb[4].mxu1 }
 0x2bb   :  { %v2723_v22 = vadd.f32 %v1924_v20, %v1192_v15  ;;  %v2725_v23 = vadd.f32 %v2006_v21, %v1200_v16  ;;  %v1926_v24 = vpop.f32.mrb[5].mxu0  ;;  %v2008_v25 = vpop.f32.mrb[5].mxu1 }
 0x2bc   :  { %v2724_v27 = vadd.f32 %v1926_v24, %v1196_v17  ;;  %v2726_v28 = vadd.f32 %v2008_v25, %v1204_v19  ;;  %v1928_v29 = vpop.f32.mrb[6].mxu0  ;;  %v2010_v30 = vpop.f32.mrb[6].mxu1 }
 0x2bd   :  { %v2013_v10 = vmax.f32 %v2723_v22, 0.0  ;;  %v2015_v31 = vmax.f32 %v2725_v23, 0.0  ;;  %v1929_v32 = vpop.f32.mrb[7].mxu0  ;;  %v2011_v26 = vpop.f32.mrb[7].mxu1 }
 0x2be   :  { %v2014_v33 = vmax.f32 %v2724_v27, 0.0  ;;  %v2016_v34 = vmax.f32 %v2726_v28, 0.0 }
 0x2bf   :  { %v2017_v9 = vpack.c.bf16 %v2013_v10, %v2013_v10  ;;  %v2019_v13 = vpack.c.bf16 %v2015_v31, %v2015_v31 }
 0x2c0   :  { %v2018_v12 = vpack.c.bf16 %v2014_v33, %v2014_v33  ;;  %v2020_v35 = vpack.c.bf16 %v2016_v34, %v2016_v34 }
 0x2c2   :  { %2316 = vmatprep.mubr.bf16.mxu0 %v2018_v12  ;;  %2356 = vmatprep.mubr.bf16.mxu1 %v2020_v35 }
 0x2c3   :  { %2317 = vmatmul.mubr.bf16.vlgmr.msra.gmra.mrb[8].mxu0 %v2017_v9  ;;  %2357 = vmatmul.mubr.bf16.vlgmr.msra.gmra.mrb[8].mxu1 %v2019_v13 }
 0x396   :  { %v2691_v36 = vpop.f32.mrb[8].mxu0  ;;  %v2713_v37 = vpop.f32.mrb[8].mxu1 }
 0x397   :  { %v2692_v39 = vpop.f32.mrb[9].mxu0  ;;  %v2714_v40 = vpop.f32.mrb[9].mxu1 }
 0x398   :  { %v2693_v41 = vadd.f32 %v2692_v39, %v2691_v36  ;;  %v2715_v11 = vadd.f32 %v2714_v40, %v2713_v37  ;;  %v2694_v42 = vpop.f32.mrb[10].mxu0  ;;  %v2716_v43 = vpop.f32.mrb[10].mxu1 }
 0x399   :  { %v2695_v44 = vpop.f32.mrb[11].mxu0  ;;  %v2717_v45 = vpop.f32.mrb[11].mxu1 }
 0x39a   :  { %v2319_v18 = vadd.f32 %v2693_v41, %v2642_v38 }
 0x39c   :  { %v2359_v46 = vadd.f32 %v2715_v11, %v2319_v18 }
 0x39e   :  { %2364 = vst [vmem:[#allocation10] sm:$0xff] %v2359_v46 }
 0x39f   :  { %3271 = shalt.err (!%p3268_p8)
}
 0x3a0   :  { %s3272_s10 = scalar_lea.hbm %s3458_s7, 128 }
 0x3a1   :  { %p3273_p9 = scmp.ne.s32.totalorder %s3458_s7, %s3272_s10  ;;  %p3276_p10 = scmp.lt.u32.totalorder %s3272_s10, %s3458_s7 }
 0x3a3   :  { %p3278_p11 = pnand %p3276_p10, %p3273_p9 }
 0x3a5   :  { %3281 = shalt.err (!%p3278_p11)
}
 0x3a6   :  { %2374 = dma.vmem_to_hbm [thread:$0]  %s2372_s30, 128, %s3458_s7, [#allocation4]  }
 0x3a7   :  { %3288 = dma.done.wait [#allocation4], 128  }
 0x3a8   :  { %3289 = vsyncadd [#allocation4], 4294967168 }
 0x3a9   :  { %2378 = vsyncpa [#allocation3], 1 }
 0x3aa   :  { %2379 = vsyncpa [#allocation6], 1 }
 0x3ab   :  { %2380 = vsyncpa [#allocation9], 1 }
 0x3ac   :  { %2381 = vsyncpa [#allocation4], 1 }

</bundles_post_ra>
